<compile_context>
chip_gen: v7x
topology: tpu7x:2x2x1
jax: 0.10.0
libtpu: 0.0.40
codegen_flags: <defaults>
</compile_context>

<pallas_src>
import jax
import jax.numpy as jnp
from jax.experimental import pallas as pl
from jax.experimental.pallas import tpu as pltpu


def _mlp_kernel(x_ref, w1_ref, b1_ref, w2_ref, b2_ref, w3_ref, b3_ref, o_ref):
    # One batch tile per grid step; weights/biases are VMEM-resident full blocks.
    x = x_ref[...]                                             # (tb, n_input)
    h1 = jnp.dot(x, w1_ref[...], preferred_element_type=jnp.float32) + b1_ref[...]
    h1 = jnp.maximum(h1, 0.0)
    h2 = jnp.dot(h1, w2_ref[...], preferred_element_type=jnp.float32) + b2_ref[...]
    h2 = jnp.maximum(h2, 0.0)                                  # (tb, n_hidden)
    # fc3: single output column -> broadcast-multiply + lane reduce (VPU/XLU),
    # stored as a narrow (tb, 1) block (only 4 B/row of HBM writeback).
    y = jnp.sum(h2 * w3_ref[...], axis=-1, keepdims=True) + b3_ref[...]
    o_ref[...] = y


def _round_up(n, m):
    return ((n + m - 1) // m) * m


def minimal_mlp_forward(x, params, *, block_batch=4096, min_grid_steps=4):
    """x: (B, n_input) f32.  params: dict of w1,b1,w2,b2 (weights (in,out)), w3 row, b3."""
    B, n_input = x.shape
    n_hidden = params["w1"].shape[1]

    # fc3 weight presented as a (1, n_hidden) row for the broadcast-reduce.
    w3_row = params["w3"].reshape(1, n_hidden)

    # Batch tile: multiple of 8 (f32 sublane).  Keep >= min_grid_steps grid steps
    # so both v7x TensorCores get work on the "parallel" batch axis, and cap at
    # block_batch to amortize per-step overhead with long DMA bursts.
    tb = min(block_batch, max(8, _round_up(pl.cdiv(B, min_grid_steps), 8)))
    bp = _round_up(B, tb)
    if bp != B:
        x = jnp.pad(x, ((0, bp - B), (0, 0)))

    const = lambda i: (0, 0)  # weights/biases: same block every grid step (stay resident)
    out = pl.pallas_call(
        _mlp_kernel,
        out_shape=jax.ShapeDtypeStruct((bp, 1), jnp.float32),
        grid=(bp // tb,),
        in_specs=[
            pl.BlockSpec((tb, n_input), lambda i: (i, 0)),    # x: tiled over batch
            pl.BlockSpec((n_input, n_hidden), const),         # w1
            pl.BlockSpec((1, n_hidden), const),               # b1
            pl.BlockSpec((n_hidden, n_hidden), const),        # w2
            pl.BlockSpec((1, n_hidden), const),               # b2
            pl.BlockSpec((1, n_hidden), const),               # w3 (as a row)
            pl.BlockSpec((1, 1), const),                      # b3
        ],
        out_specs=pl.BlockSpec((tb, 1), lambda i: (i, 0)),    # narrow output: 4 B/row
        compiler_params=pltpu.CompilerParams(
            dimension_semantics=("parallel",),
        ),
    )(
        x,
        params["w1"], params["b1"],
        params["w2"], params["b2"],
        w3_row, params["b3"],
    )
    return out[:B]


def init_params(key, n_input=8, n_hidden=16):
    """Deterministic synthetic init (uniform, roughly like PyTorch's kaiming-uniform bounds)."""
    ks = jax.random.split(key, 6)

    def unif(k, shape, fan_in):
        bound = 1.0 / jnp.sqrt(jnp.float32(fan_in))
        return jax.random.uniform(k, shape, jnp.float32, -bound, bound)

    return {
        # stored as (in, out) == transpose of torch's (out, in)
        "w1": unif(ks[0], (n_input, n_hidden), n_input),
        "b1": unif(ks[1], (1, n_hidden), n_input),
        "w2": unif(ks[2], (n_hidden, n_hidden), n_hidden),
        "b2": unif(ks[3], (1, n_hidden), n_hidden),
        "w3": unif(ks[4], (n_hidden, 1), n_hidden),
        "b3": unif(ks[5], (1, 1), n_hidden),
    }


def _reference_forward(x, p):
    h1 = jnp.maximum(x @ p["w1"] + p["b1"], 0.0)
    h2 = jnp.maximum(h1 @ p["w2"] + p["b2"], 0.0)
    return h2 @ p["w3"] + p["b3"]


if __name__ == "__main__":
    key = jax.random.PRNGKey(0)
    k_param, k_small, k_large = jax.random.split(key, 3)

    n_input, n_hidden = 8, 16
    params = init_params(k_param, n_input=n_input, n_hidden=n_hidden)

    # Small batch (the module's toy scale): single grid step, no padding needed.
    x_small = jax.random.normal(k_small, (8, n_input), jnp.float32)
    out_small = jax.block_until_ready(minimal_mlp_forward(x_small, params))
    ref_small = _reference_forward(x_small, params)
    assert out_small.shape == (8, 1), out_small.shape
    assert jnp.allclose(out_small, ref_small, atol=1e-4, rtol=1e-5), "small-batch mismatch"

    # Larger batch: exercises the multi-step pipelined grid path (4 steps of 512 rows).
    x_large = jax.random.normal(k_large, (2048, n_input), jnp.float32)
    out_large = jax.block_until_ready(minimal_mlp_forward(x_large, params))
    ref_large = _reference_forward(x_large, params)
    assert out_large.shape == (2048, 1), out_large.shape
    assert jnp.allclose(out_large, ref_large, atol=1e-4, rtol=1e-5), "large-batch mismatch"

    print("KERNEL_OK")
</pallas_src>

<mosaic_0001>
module attributes {stable_mosaic.version = 11 : i64} {
  func.func @_mlp_kernel(%arg0: i32, %arg1: memref<8x8xf32, #tpu.memory_space<vmem>>, %arg2: memref<8x16xf32, #tpu.memory_space<vmem>>, %arg3: memref<1x16xf32, #tpu.memory_space<vmem>>, %arg4: memref<16x16xf32, #tpu.memory_space<vmem>>, %arg5: memref<1x16xf32, #tpu.memory_space<vmem>>, %arg6: memref<1x16xf32, #tpu.memory_space<vmem>>, %arg7: memref<1x1xf32, #tpu.memory_space<vmem>>, %arg8: memref<8x1xf32, #tpu.memory_space<vmem>>) attributes {dimension_semantics = [#tpu.dimension_semantics<parallel>], iteration_bounds = array<i64: 1>, scalar_prefetch = 0 : i64, scratch_operands = 0 : i64, tpu.core_type = #tpu.core_type<tc>, window_params = [{transform_indices = @transform_0, window_bounds = array<i64: 8, 8>}, {pipeline_mode = #tpu.pipeline_mode<synchronous>, transform_indices = @transform_1, window_bounds = array<i64: 8, 16>}, {pipeline_mode = #tpu.pipeline_mode<synchronous>, transform_indices = @transform_2, window_bounds = array<i64: 1, 16>}, {pipeline_mode = #tpu.pipeline_mode<synchronous>, transform_indices = @transform_3, window_bounds = array<i64: 16, 16>}, {pipeline_mode = #tpu.pipeline_mode<synchronous>, transform_indices = @transform_4, window_bounds = array<i64: 1, 16>}, {pipeline_mode = #tpu.pipeline_mode<synchronous>, transform_indices = @transform_5, window_bounds = array<i64: 1, 16>}, {pipeline_mode = #tpu.pipeline_mode<synchronous>, transform_indices = @transform_6, window_bounds = array<i64: 1, 1>}, {transform_indices = @transform_7, window_bounds = array<i64: 8, 1>}]} {
    %c0 = arith.constant 0 : index
    %c0_0 = arith.constant 0 : index
    %0 = vector.load %arg1[%c0, %c0_0] : memref<8x8xf32, #tpu.memory_space<vmem>>, vector<8x8xf32>
    %c0_1 = arith.constant 0 : index
    %c0_2 = arith.constant 0 : index
    %1 = vector.load %arg2[%c0_1, %c0_2] : memref<8x16xf32, #tpu.memory_space<vmem>>, vector<8x16xf32>
    %cst = arith.constant dense<0.000000e+00> : vector<8x16xf32>
    %2 = tpu.matmul %0, %1, %cst {dimension_numbers = #tpu.dot_dimension_numbers<[1], [0], [0], [1], [0, 0, 1, 1], [], []>} : vector<8x8xf32>, vector<8x16xf32>, vector<8x16xf32> -> vector<8x16xf32>
    %c0_3 = arith.constant 0 : index
    %c0_4 = arith.constant 0 : index
    %3 = vector.load %arg3[%c0_3, %c0_4] : memref<1x16xf32, #tpu.memory_space<vmem>>, vector<1x16xf32>
    %4 = vector.broadcast %3 : vector<1x16xf32> to vector<8x16xf32>
    %5 = arith.addf %2, %4 : vector<8x16xf32>
    %cst_5 = arith.constant 0.000000e+00 : f32
    %6 = vector.broadcast %cst_5 : f32 to vector<8x16xf32>
    %7 = arith.maximumf %5, %6 : vector<8x16xf32>
    %c0_6 = arith.constant 0 : index
    %c0_7 = arith.constant 0 : index
    %8 = vector.load %arg4[%c0_6, %c0_7] : memref<16x16xf32, #tpu.memory_space<vmem>>, vector<16x16xf32>
    %cst_8 = arith.constant dense<0.000000e+00> : vector<8x16xf32>
    %9 = tpu.matmul %7, %8, %cst_8 {dimension_numbers = #tpu.dot_dimension_numbers<[1], [0], [0], [1], [0, 0, 1, 1], [], []>} : vector<8x16xf32>, vector<16x16xf32>, vector<8x16xf32> -> vector<8x16xf32>
    %c0_9 = arith.constant 0 : index
    %c0_10 = arith.constant 0 : index
    %10 = vector.load %arg5[%c0_9, %c0_10] : memref<1x16xf32, #tpu.memory_space<vmem>>, vector<1x16xf32>
    %11 = vector.broadcast %10 : vector<1x16xf32> to vector<8x16xf32>
    %12 = arith.addf %9, %11 : vector<8x16xf32>
    %cst_11 = arith.constant 0.000000e+00 : f32
    %13 = vector.broadcast %cst_11 : f32 to vector<8x16xf32>
    %14 = arith.maximumf %12, %13 : vector<8x16xf32>
    %c0_12 = arith.constant 0 : index
    %c0_13 = arith.constant 0 : index
    %15 = vector.load %arg6[%c0_12, %c0_13] : memref<1x16xf32, #tpu.memory_space<vmem>>, vector<1x16xf32>
    %16 = vector.broadcast %15 : vector<1x16xf32> to vector<8x16xf32>
    %17 = arith.mulf %14, %16 : vector<8x16xf32>
    %cst_14 = arith.constant dense<0.000000e+00> : vector<8xf32>
    %18 = vector.multi_reduction <add>, %17, %cst_14 [1] : vector<8x16xf32> to vector<8xf32>
    %19 = vector.shape_cast %18 : vector<8xf32> to vector<8x1xf32>
    %c0_15 = arith.constant 0 : index
    %c0_16 = arith.constant 0 : index
    %20 = vector.load %arg7[%c0_15, %c0_16] : memref<1x1xf32, #tpu.memory_space<vmem>>, vector<1x1xf32>
    %21 = vector.broadcast %20 : vector<1x1xf32> to vector<8x1xf32>
    %22 = arith.addf %19, %21 : vector<8x1xf32>
    %c0_17 = arith.constant 0 : index
    %c0_18 = arith.constant 0 : index
    %23 = vector.load %arg8[%c0_17, %c0_18] : memref<8x1xf32, #tpu.memory_space<vmem>>, vector<8x1xf32>
    tpu.vector_store %arg8[%c0_17, %c0_18], %22 {strides = array<i32>} : memref<8x1xf32, #tpu.memory_space<vmem>>, vector<8x1xf32>,
    return
  }
  func.func @transform_0(%arg0: i32) -> (i32, i32) {
    %c0_i32 = arith.constant 0 : i32
    %c0_i32_0 = arith.constant 0 : i32
    return %arg0, %c0_i32 : i32, i32
  }
  func.func @transform_1(%arg0: i32) -> (i32, i32) {
    %c0_i32 = arith.constant 0 : i32
    %c0_i32_0 = arith.constant 0 : i32
    %c0_i32_1 = arith.constant 0 : i32
    return %c0_i32, %c0_i32_0 : i32, i32
  }
  func.func @transform_2(%arg0: i32) -> (i32, i32) {
    %c0_i32 = arith.constant 0 : i32
    %c0_i32_0 = arith.constant 0 : i32
    %c0_i32_1 = arith.constant 0 : i32
    return %c0_i32, %c0_i32_0 : i32, i32
  }
  func.func @transform_3(%arg0: i32) -> (i32, i32) {
    %c0_i32 = arith.constant 0 : i32
    %c0_i32_0 = arith.constant 0 : i32
    %c0_i32_1 = arith.constant 0 : i32
    return %c0_i32, %c0_i32_0 : i32, i32
  }
  func.func @transform_4(%arg0: i32) -> (i32, i32) {
    %c0_i32 = arith.constant 0 : i32
    %c0_i32_0 = arith.constant 0 : i32
    %c0_i32_1 = arith.constant 0 : i32
    return %c0_i32, %c0_i32_0 : i32, i32
  }
  func.func @transform_5(%arg0: i32) -> (i32, i32) {
    %c0_i32 = arith.constant 0 : i32
    %c0_i32_0 = arith.constant 0 : i32
    %c0_i32_1 = arith.constant 0 : i32
    return %c0_i32, %c0_i32_0 : i32, i32
  }
  func.func @transform_6(%arg0: i32) -> (i32, i32) {
    %c0_i32 = arith.constant 0 : i32
    %c0_i32_0 = arith.constant 0 : i32
    %c0_i32_1 = arith.constant 0 : i32
    return %c0_i32, %c0_i32_0 : i32, i32
  }
  func.func @transform_7(%arg0: i32) -> (i32, i32) {
    %c0_i32 = arith.constant 0 : i32
    %c0_i32_0 = arith.constant 0 : i32
    return %arg0, %c0_i32 : i32, i32
  }
}

</mosaic_0001>

<bundles_post_ra>
// kernel: tpu_custom_call.1
= control target key start
LH: loop header
LB: loop body
LE: loop exit
PB: predicated region body
PF: predicated region fallthrough
CT: control target
= control target key end

     0   :  { %s463_s0 = inlined_call_operand.hbm [shape: f32[8,8], index: 0, kind: input, shape index: {}]   ;;  %s464_s1 = inlined_call_operand.hbm [shape: f32[8,16], index: 1, kind: input, shape index: {}]   ;;  %s465_s2 = inlined_call_operand.vmem [shape: f32[1,16], index: 2, kind: input, shape index: {}]   ;;  %s466_s3 = inlined_call_operand.hbm [shape: f32[16,16], index: 3, kind: input, shape index: {}]   ;;  %s467_s4 = inlined_call_operand.vmem [shape: f32[1,16], index: 4, kind: input, shape index: {}]   ;;  %s468_s5 = inlined_call_operand.vmem [shape: f32[1,16], index: 5, kind: input, shape index: {}]   ;;  %s469_s6 = inlined_call_operand.<no memory space> [shape: f32[1,1], index: 6, kind: input, shape index: {}]   ;;  %s470_s7 = inlined_call_operand.vmem [shape: f32[8,1], index: 7, kind: output, shape index: {}]  }
   0x1   :  { %v12_v0 = vstv %s469_s6 }
   0x2   :  { %13 = vst [vmem:[#allocation2] sm:$0x1] %v12_v0 }
   0x3   :  { %14 = vsyncpa [#allocation4], 0 }
   0x4   :  { %15 = vsyncpa [#allocation6], 0  ;;  %s364_s26 = smov [#allocation5]   ;;  %s365_s28 = smov [#allocation3]  }
   0x5   :  { %s32_s27 = sshll.u32 %s364_s26, 4  ;;  %s22_s29 = sshll.u32 %s365_s28, 4  ;;  %s33_s27 = int_to_ptr.vmem [resolvable:$true] %s32_s27  ;;  %s23_s29 = int_to_ptr.vmem [resolvable:$true] %s22_s29 }
   0x6   :  { %s294_s9 = scalar_lea.hbm %s464_s1, 128 }
   0x7   :  { %p295_p0 = scmp.ne.s32.totalorder %s464_s1, %s294_s9  ;;  %p298_p1 = scmp.lt.u32.totalorder %s294_s9, %s464_s1 }
   0x9   :  { %p300_p2 = pnand %p298_p1, %p295_p0 }
   0xb   :  { %303 = shalt.err (!%p300_p2)
}
   0xc   :  { %s304_s6 = scalar_lea.vmem %s33_s27, 128  ;;  %p309_p4 = scmp.lt.s32.totalorder %s33_s27, %s33_s27 }
   0xd   :  { %p305_p3 = scmp.ne.s32.totalorder %s33_s27, %s304_s6  ;;  %p310_p5 = scmp.lt.s32.totalorder %s304_s6, %s304_s6 }
   0xf   :  { %p311_p6 = por %p310_p5, %p309_p4 }
  0x11   :  { %p312_p7 = pnand %p311_p6, %p305_p3 }
  0x13   :  { %315 = shalt.err (!%p312_p7)
}
  0x14   :  { %35 = dma.hbm_to_vmem [thread:$0]  %s464_s1, 128, %s33_s27, [#allocation6]  }
  0x15   :  { %s316_s18 = scalar_lea.hbm %s463_s0, 128 }
  0x16   :  { %p317_p8 = scmp.ne.s32.totalorder %s463_s0, %s316_s18  ;;  %p320_p9 = scmp.lt.u32.totalorder %s316_s18, %s463_s0 }
  0x18   :  { %p322_p10 = pnand %p320_p9, %p317_p8 }
  0x1a   :  { %325 = shalt.err (!%p322_p10)
}
  0x1b   :  { %s326_s23 = scalar_lea.vmem %s23_s29, 128  ;;  %p331_p12 = scmp.lt.s32.totalorder %s23_s29, %s23_s29 }
  0x1c   :  { %p327_p11 = scmp.ne.s32.totalorder %s23_s29, %s326_s23  ;;  %p332_p13 = scmp.lt.s32.totalorder %s326_s23, %s326_s23 }
  0x1e   :  { %p333_p0 = por %p332_p13, %p331_p12 }
  0x20   :  { %p334_p1 = pnand %p333_p0, %p327_p11 }
  0x22   :  { %337 = shalt.err (!%p334_p1)
}
  0x23   :  { %25 = dma.hbm_to_vmem [thread:$0]  %s463_s0, 128, %s23_s29, [#allocation4]  }
  0x24   :  { %s366_s25 = smov [#allocation7]   ;;  %s338_s30 = scalar_lea.hbm %s466_s3, 256 }
  0x25   :  { %s43_s26 = sshll.u32 %s366_s25, 4  ;;  %p339_p2 = scmp.ne.s32.totalorder %s466_s3, %s338_s30  ;;  %s44_s26 = int_to_ptr.vmem [resolvable:$true] %s43_s26 }
  0x26   :  { %p342_p3 = scmp.lt.u32.totalorder %s338_s30, %s466_s3 }
  0x28   :  { %p344_p4 = pnand %p342_p3, %p339_p2 }
  0x2a   :  { %347 = shalt.err (!%p344_p4)
}
  0x2b   :  { %s348_s12 = scalar_lea.vmem %s44_s26, 256  ;;  %p353_p6 = scmp.lt.s32.totalorder %s44_s26, %s44_s26 }
  0x2c   :  { %p349_p5 = scmp.ne.s32.totalorder %s44_s26, %s348_s12  ;;  %p354_p7 = scmp.lt.s32.totalorder %s348_s12, %s348_s12 }
  0x2e   :  { %p355_p8 = por %p354_p7, %p353_p6 }
  0x30   :  { %p356_p9 = pnand %p355_p8, %p349_p5 }
  0x32   :  { %359 = shalt.err (!%p356_p9)
}
  0x33   :  { %s367_s0 = smov 128   ;;  %s368_s29 = smov 8  }
  0x34   :  { %49 = dma.hbm_to_vmem [thread:$0]  %s466_s3, 256, %s44_s26, [#allocation6], %s367_s0, %s367_s0, %s368_s29  }
  0x35   :  { %360 = dma.done.wait [#allocation4], 128  }
  0x36   :  { %361 = vsyncadd [#allocation4], 4294967168 }
  0x37   :  { %362 = dma.done.wait [#allocation6], 384  }
  0x38   :  { %363 = vsyncadd [#allocation6], 4294966912  ;;  %v369_v1 = vmov 0.0   ;;  %vm370_vm0 = vmmov 0   ;;  %vm74_vm1 = vcmask 64512   ;;  %v66_v2 = vld [vmem:[#allocation5] sm:$0xff] }
  0x39   :  { %271 = vmatprep.subr.mxu0 %v369_v1  ;;  %273 = vmatprep.mubr.msk.f32.mxu0 %vm370_vm0, %v369_v1  ;;  %v65_v3 = vld [vmem:[#allocation3] sm:$0xff]  ;;  %v149_v4 = vld [vmem:[#allocation7] sm:$0xff]  ;;  %v150_v5 = vld [vmem:[#allocation7 + $0x8] sm:$0xff]  ;;  %v371_v7 = vmov 0.0|0.0   ;;  %vm158_vm2 = vcmask 130048   ;;  %vm252_vm3 = vcmask 7168  }
  0x3a   :  { %280 = vmatprep.mubr.msk.f32.mxu1 %vm370_vm0, %v369_v1  ;;  %272 = vmatpush3.msra.mxu0 %v66_v2  ;;  %v284_v6 = vpack.c.bf16 %v150_v5, %v149_v4  ;;  %v260_v8 = vld [vmem:[%s465_s2] ss:$0 sm:$0xff] }
  0x3b   :  { %274 = vmatmul.mubr.msk.f32.vlgmr.msra.gmra.mrb[0].mxu0 %vm74_vm1, %v65_v3  ;;  %283 = vmatprep.subr.bf16.mxu1 %v371_v7  ;;  %v262_v13 = vld [vmem:[%s467_s4] ss:$0 sm:$0xff] }
  0x3c   :  { %285 = vmatpush3.bf16.msra.mxu1 %v284_v6  ;;  %v264_v17 = vld [vmem:[%s468_s5] ss:$0 sm:$0xff] }
  0x3d   :  { %v265_v21 = vld [vmem:[#allocation2] ss:$0 sm:$0xff] }
 0x10e   :  { %v144_v9 = vpop.f32.mrb[0].mxu0 }
 0x10f   :  { %v145_v10 = vadd.f32 %v260_v8, %v144_v9  ;;  %v275_v11 = vpop.f32.mrb[1].mxu0 }
 0x111   :  { %v148_v12 = vmax.f32 %v145_v10, 0.0 }
 0x113   :  { %281 = vmatmul.mubr.msk.f32.vlgmr.msra.gmra.mrb[0].mxu1 %vm158_vm2, %v148_v12 }
 0x1e6   :  { %v228_v14 = vpop.f32.mrb[0].mxu1 }
 0x1e7   :  { %v229_v15 = vadd.f32 %v262_v13, %v228_v14  ;;  %v282_v16 = vpop.f32.mrb[1].mxu1 }
 0x1e9   :  { %v232_v18 = vmax.f32 %v229_v15, 0.0 }
 0x1eb   :  { %v240_v19 = vmul.f32 %v264_v17, %v232_v18 }
 0x1ed   :  { %v241_v20 = vsel %vm158_vm2, %v240_v19, 0.0 }
 0x1ee   :  { %242 = vadd.xlane.f32.xlu0 %v241_v20 }
 0x27b   :  { %v243_v22 = vpop.xlane.xlu0 %242 }
 0x27c   :  { %v251_v23 = vadd.f32 %v265_v21, %v243_v22 }
 0x27e   :  { %253 = vst.msk [vmem:[%s470_s7] sm:$0xff] %vm252_vm3, %v251_v23 }
 0x27f   :  { %258 = vsyncpa [#allocation4], 1 }
 0x280   :  { %259 = vsyncpa [#allocation6], 1 }

</bundles_post_ra>
